<compile_context>
chip_gen: v7x
topology: tpu7x:2x2x1
jax: 0.10.0
libtpu: 0.0.40
codegen_flags: <defaults>
</compile_context>

<pallas_src>
import jax
import jax.numpy as jnp
from jax.experimental import pallas as pl
from jax.experimental.pallas import tpu as pltpu

IN_FEATURES = 1280
OUT_FEATURES = 384
_SUBLANE = 16  # bf16 sublane pack


def _round_up(v, m):
    return ((v + m - 1) // m) * m


def linear_kernel(x_ref, w_ref, b_ref, o_ref):
    """One M-tile of y = x @ W_t + b.

    x_ref: (tm, K) bf16 input tile (pipelined over M)
    w_ref: (K, N)  bf16 transposed weight (VMEM-resident, single-buffered)
    b_ref: (1, N)  f32 bias (VMEM-resident, single-buffered)
    o_ref: (tm, N) output tile
    """
    acc = jnp.dot(x_ref[...], w_ref[...], preferred_element_type=jnp.float32)
    o_ref[...] = (acc + b_ref[...]).astype(o_ref.dtype)


def linear_pallas(x, w_t, b, *, tm_max=1024, out_dtype=jnp.float32):
    """y = x @ w_t + b  (x: [M, K], w_t: [K, N], b: [N]) via Pallas."""
    M, K = x.shape
    Kw, N = w_t.shape
    assert K == Kw and b.shape == (N,)
    assert K % 128 == 0 and N % 128 == 0

    # bf16 inputs, f32 accumulation on the MXU (native bf16 path on v5e/v6e/v7x).
    x = x.astype(jnp.bfloat16)
    w_t = w_t.astype(jnp.bfloat16)
    b2 = b.astype(jnp.float32).reshape(1, N)

    # Tiny pad only when M is below one bf16 sublane pack; larger remainders
    # are handled as a partial trailing block (no full-array copy of x).
    m_eff = M
    if M < _SUBLANE:
        x = jnp.pad(x, ((0, _SUBLANE - M), (0, 0)))
        m_eff = _SUBLANE

    # M tile: multiple of 16, capped at tm_max, and sized so any batch with
    # enough work yields >= 2 grid steps (keeps both v7x TensorCores busy).
    tm = min(tm_max, _round_up(pl.cdiv(m_eff, 2), _SUBLANE))
    grid_m = pl.cdiv(m_eff, tm)

    cost = pl.CostEstimate(
        flops=2 * m_eff * K * N,
        transcendentals=0,
        bytes_accessed=(
            m_eff * K * x.dtype.itemsize       # x stream
            + K * N * w_t.dtype.itemsize       # weight panel (read once)
            + N * 4                            # bias
            + m_eff * N * jnp.dtype(out_dtype).itemsize  # output
        ),
    )

    y = pl.pallas_call(
        linear_kernel,
        out_shape=jax.ShapeDtypeStruct((m_eff, N), out_dtype),
        grid_spec=pltpu.PrefetchScalarGridSpec(
            num_scalar_prefetch=0,
            grid=(grid_m,),
            in_specs=[
                # x tile: double-buffered stream over M.
                pl.BlockSpec((tm, K), lambda m: (m, 0)),
                # Full W_t: constant index_map -> fetched once, single buffer.
                pl.BlockSpec((K, N), lambda m: (0, 0),
                             pipeline_mode=pl.Buffered(buffer_count=1)),
                # Bias: resident, single buffer.
                pl.BlockSpec((1, N), lambda m: (0, 0),
                             pipeline_mode=pl.Buffered(buffer_count=1)),
            ],
            out_specs=pl.BlockSpec((tm, N), lambda m: (m, 0)),
        ),
        compiler_params=pltpu.CompilerParams(
            dimension_semantics=("parallel",),
        ),
        cost_estimate=cost,
    )(x, w_t, b2)

    return y[:M] if m_eff != M else y


class ImageEmbeddingNetPallas:
    """Pallas equivalent of ImageEmbeddingNet: a single Linear(1280 -> 384)."""

    def __init__(self, key):
        kw, kb = jax.random.split(key)
        # Deterministic init mimicking PyTorch's default (uniform +- 1/sqrt(fan_in)).
        bound = 1.0 / (IN_FEATURES ** 0.5)
        w = jax.random.uniform(
            kw, (OUT_FEATURES, IN_FEATURES), jnp.float32, -bound, bound
        )
        # Weight stored transposed and pre-cast to bf16 (halves weight-DMA bytes);
        # bias stays f32 and is added after the f32-accumulated matmul.
        self.w_t = jnp.asarray(w.T, dtype=jnp.bfloat16)  # [1280, 384]
        self.b = jax.random.uniform(
            kb, (OUT_FEATURES,), jnp.float32, -bound, bound
        )

    def __call__(self, x):
        # x: [..., 1280] -> [..., 384]; flatten leading dims like nn.Linear.
        lead = x.shape[:-1]
        x2 = x.reshape(-1, IN_FEATURES)
        y = linear_pallas(x2, self.w_t, self.b)
        return y.reshape(*lead, OUT_FEATURES)


if __name__ == "__main__":
    key = jax.random.PRNGKey(0)
    k_x, k_params = jax.random.split(key)

    batch = 8  # small batch; feature dims fixed by the module (1280 -> 384)
    x = jax.random.normal(k_x, (batch, IN_FEATURES), jnp.float32)

    model = ImageEmbeddingNetPallas(k_params)
    y = jax.block_until_ready(model(x))

    # Reference with the same bf16-input / f32-accumulate numerics as the kernel.
    x_bf = x.astype(jnp.bfloat16)
    y_ref = (
        jnp.dot(x_bf, model.w_t, preferred_element_type=jnp.float32) + model.b
    )
    assert y.shape == (batch, OUT_FEATURES)
    assert jnp.allclose(y, y_ref, atol=1e-3, rtol=1e-3)

    print("KERNEL_OK")
</pallas_src>

<mosaic_0001>
module attributes {stable_mosaic.version = 11 : i64} {
  func.func @linear_kernel(%arg0: i32, %arg1: memref<16x1280xbf16, #tpu.memory_space<vmem>>, %arg2: memref<1280x384xbf16, #tpu.memory_space<vmem>>, %arg3: memref<1x384xf32, #tpu.memory_space<vmem>>, %arg4: memref<16x384xf32, #tpu.memory_space<vmem>>) attributes {dimension_semantics = [#tpu.dimension_semantics<parallel>], iteration_bounds = array<i64: 1>, scalar_prefetch = 0 : i64, scratch_operands = 0 : i64, tpu.core_type = #tpu.core_type<tc>, window_params = [{transform_indices = @transform_0, window_bounds = array<i64: 16, 1280>}, {pipeline_mode = #tpu.pipeline_mode<synchronous>, transform_indices = @transform_1, window_bounds = array<i64: 1280, 384>}, {pipeline_mode = #tpu.pipeline_mode<synchronous>, transform_indices = @transform_2, window_bounds = array<i64: 1, 384>}, {transform_indices = @transform_3, window_bounds = array<i64: 16, 384>}]} {
    %c0 = arith.constant 0 : index
    %c0_0 = arith.constant 0 : index
    %0 = vector.load %arg1[%c0, %c0_0] : memref<16x1280xbf16, #tpu.memory_space<vmem>>, vector<16x1280xbf16>
    %c0_1 = arith.constant 0 : index
    %c0_2 = arith.constant 0 : index
    %1 = vector.load %arg2[%c0_1, %c0_2] : memref<1280x384xbf16, #tpu.memory_space<vmem>>, vector<1280x384xbf16>
    %cst = arith.constant dense<0.000000e+00> : vector<16x384xf32>
    %2 = tpu.matmul %0, %1, %cst {dimension_numbers = #tpu.dot_dimension_numbers<[1], [0], [0], [1], [0, 0, 1, 1], [], []>} : vector<16x1280xbf16>, vector<1280x384xbf16>, vector<16x384xf32> -> vector<16x384xf32>
    %c0_3 = arith.constant 0 : index
    %c0_4 = arith.constant 0 : index
    %3 = vector.load %arg3[%c0_3, %c0_4] : memref<1x384xf32, #tpu.memory_space<vmem>>, vector<1x384xf32>
    %4 = vector.broadcast %3 : vector<1x384xf32> to vector<16x384xf32>
    %5 = arith.addf %2, %4 : vector<16x384xf32>
    %c0_5 = arith.constant 0 : index
    %c0_6 = arith.constant 0 : index
    %6 = vector.load %arg4[%c0_5, %c0_6] : memref<16x384xf32, #tpu.memory_space<vmem>>, vector<16x384xf32>
    tpu.vector_store %arg4[%c0_5, %c0_6], %5 {strides = array<i32>} : memref<16x384xf32, #tpu.memory_space<vmem>>, vector<16x384xf32>,
    return
  }
  func.func @transform_0(%arg0: i32) -> (i32, i32) {
    %c0_i32 = arith.constant 0 : i32
    %c0_i32_0 = arith.constant 0 : i32
    return %arg0, %c0_i32 : i32, i32
  }
  func.func @transform_1(%arg0: i32) -> (i32, i32) {
    %c0_i32 = arith.constant 0 : i32
    %c0_i32_0 = arith.constant 0 : i32
    %c0_i32_1 = arith.constant 0 : i32
    return %c0_i32, %c0_i32_0 : i32, i32
  }
  func.func @transform_2(%arg0: i32) -> (i32, i32) {
    %c0_i32 = arith.constant 0 : i32
    %c0_i32_0 = arith.constant 0 : i32
    %c0_i32_1 = arith.constant 0 : i32
    return %c0_i32, %c0_i32_0 : i32, i32
  }
  func.func @transform_3(%arg0: i32) -> (i32, i32) {
    %c0_i32 = arith.constant 0 : i32
    %c0_i32_0 = arith.constant 0 : i32
    return %arg0, %c0_i32 : i32, i32
  }
}

</mosaic_0001>

<bundles_post_ra>
// kernel: tpu_custom_call.1
= control target key start
LH: loop header
LB: loop body
LE: loop exit
PB: predicated region body
PF: predicated region fallthrough
CT: control target
= control target key end

     0   :  { %8 = vsyncpa [#allocation3], 0  ;;  %s3049_s0 = inlined_call_operand.hbm [shape: bf16[16,1280], index: 0, kind: input, shape index: {}]   ;;  %s3050_s1 = inlined_call_operand.hbm [shape: bf16[1280,384], index: 1, kind: input, shape index: {}]   ;;  %s3051_s2 = inlined_call_operand.vmem [shape: f32[1,384], index: 2, kind: input, shape index: {}]   ;;  %s3052_s3 = inlined_call_operand.hbm [shape: f32[16,384], index: 3, kind: output, shape index: {}]  }
   0x1   :  { %9 = vsyncpa [#allocation6], 0 }
   0x2   :  { %10 = vsyncpa [#allocation4], 0  ;;  %s2961_s12 = smov [#allocation2]   ;;  %s2889_s16 = scalar_lea.hbm %s3049_s0, 1280 }
   0x3   :  { %s16_s13 = sshll.u32 %s2961_s12, 4  ;;  %p2890_p0 = scmp.ne.s32.totalorder %s3049_s0, %s2889_s16  ;;  %s17_s13 = int_to_ptr.vmem [resolvable:$true] %s16_s13 }
   0x4   :  { %p2893_p1 = scmp.lt.u32.totalorder %s2889_s16, %s3049_s0 }
   0x6   :  { %p2895_p2 = pnand %p2893_p1, %p2890_p0 }
   0x8   :  { %2898 = shalt.err (!%p2895_p2)
}
   0x9   :  { %s2899_s21 = scalar_lea.vmem %s17_s13, 1280  ;;  %p2904_p4 = scmp.lt.s32.totalorder %s17_s13, %s17_s13 }
   0xa   :  { %p2900_p3 = scmp.ne.s32.totalorder %s17_s13, %s2899_s21  ;;  %p2905_p5 = scmp.lt.s32.totalorder %s2899_s21, %s2899_s21 }
   0xc   :  { %p2906_p6 = por %p2905_p5, %p2904_p4 }
   0xe   :  { %p2907_p7 = pnand %p2906_p6, %p2900_p3 }
  0x10   :  { %2910 = shalt.err (!%p2907_p7)
}
  0x11   :  { %s2962_s22 = smov 640   ;;  %s2963_s23 = smov 40  }
  0x12   :  { %22 = dma.hbm_to_vmem [thread:$0]  %s3049_s0, 1280, %s17_s13, [#allocation3], %s2962_s22, %s2962_s22, %s2963_s23  }
  0x13   :  { %s2964_s26 = smov [#allocation5]   ;;  %s2911_s30 = scalar_lea.hbm %s3050_s1, 30720 }
  0x14   :  { %s28_s27 = sshll.u32 %s2964_s26, 4  ;;  %p2912_p8 = scmp.ne.s32.totalorder %s3050_s1, %s2911_s30  ;;  %s29_s27 = int_to_ptr.vmem [resolvable:$true] %s28_s27 }
  0x15   :  { %p2915_p9 = scmp.lt.u32.totalorder %s2911_s30, %s3050_s1 }
  0x17   :  { %p2917_p10 = pnand %p2915_p9, %p2912_p8 }
  0x19   :  { %2920 = shalt.err (!%p2917_p10)
}
  0x1a   :  { %s2921_s8 = scalar_lea.vmem %s29_s27, 30720  ;;  %p2926_p12 = scmp.lt.s32.totalorder %s29_s27, %s29_s27 }
  0x1b   :  { %p2922_p11 = scmp.ne.s32.totalorder %s29_s27, %s2921_s8  ;;  %p2927_p13 = scmp.lt.s32.totalorder %s2921_s8, %s2921_s8 }
  0x1d   :  { %p2928_p0 = por %p2927_p13, %p2926_p12 }
  0x1f   :  { %p2929_p1 = pnand %p2928_p0, %p2922_p11 }
  0x21   :  { %2932 = shalt.err (!%p2929_p1)
}
  0x22   :  { %s2965_s0 = smov 192   ;;  %s2966_s9 = smov 12  }
  0x23   :  { %34 = dma.hbm_to_vmem [thread:$0]  %s3050_s1, 30720, %s29_s27, [#allocation6], %s2965_s0, %s2965_s0, %s2966_s9  }
  0x24   :  { %2955 = dma.done.wait [#allocation3], 1280  }
  0x25   :  { %2956 = vsyncadd [#allocation3], 4294966016 }
  0x26   :  { %2957 = dma.done.wait [#allocation6], 30720  }
  0x27   :  { %2958 = vsyncadd [#allocation6], 4294936576  ;;  %v2554_v0 = vld [vmem:[#allocation5 + $0x4] ss:$12 sps:$4 sm:$0xff]   ;;  %v2558_v2 = vld [vmem:[#allocation5] ss:$12 sps:$4 sm:$0xff]  }
  0x28   :  { %v2556_v1 = vld [vmem:[#allocation5 + $0x184] ss:$12 sps:$4 sm:$0xff]   ;;  %1721 = vmatprep.subr.bf16.mxu1 %v2554_v0  ;;  %v2559_v3 = vld [vmem:[#allocation5 + $0x180] ss:$12 sps:$4 sm:$0xff]   ;;  %v2560_v4 = vld [vmem:[#allocation5 + $0x1c] ss:$12 sps:$4 sm:$0xff]  }
  0x29   :  { %1764 = vmatprep.subr.bf16.mxu0 %v2556_v1  ;;  %1722 = vmatpush1.bf16.msra.mxu1 %v2558_v2  ;;  %v2562_v5 = vld [vmem:[#allocation5 + $0x19c] ss:$12 sps:$4 sm:$0xff]   ;;  %v2564_v6 = vld [vmem:[#allocation5 + $0x18] ss:$12 sps:$4 sm:$0xff]   ;;  %v2566_v8 = vld [vmem:[#allocation5 + $0x34] ss:$12 sps:$4 sm:$0xff]  }
  0x2a   :  { %1765 = vmatpush1.bf16.msra.mxu0 %v2559_v3  ;;  %1723 = vmatprep.subr.bf16.mxu1 %v2560_v4  ;;  %v2565_v7 = vld [vmem:[#allocation5 + $0x198] ss:$12 sps:$4 sm:$0xff]   ;;  %v2568_v9 = vld [vmem:[#allocation5 + $0x1b4] ss:$12 sps:$4 sm:$0xff]   ;;  %v2570_v10 = vld [vmem:[#allocation5 + $0x30] ss:$12 sps:$4 sm:$0xff]  }
  0x2b   :  { %1766 = vmatprep.subr.bf16.mxu0 %v2562_v5  ;;  %v2571_v11 = vld [vmem:[#allocation5 + $0x1b0] ss:$12 sps:$4 sm:$0xff]   ;;  %v2572_v12 = vld [vmem:[#allocation5 + $0x4c] ss:$12 sps:$4 sm:$0xff]   ;;  %v2576_v14 = vld [vmem:[#allocation5 + $0x48] ss:$12 sps:$4 sm:$0xff]  }
  0x2c   :  { %v2574_v13 = vld [vmem:[#allocation5 + $0x1cc] ss:$12 sps:$4 sm:$0xff]   ;;  %v2577_v15 = vld [vmem:[#allocation5 + $0x1c8] ss:$12 sps:$4 sm:$0xff]   ;;  %v2578_v16 = vld [vmem:[#allocation5 + $0x64] ss:$12 sps:$4 sm:$0xff]  }
  0x2d   :  { %1724 = vmatpush1.bf16.msra.mxu1 %v2564_v6  ;;  %v2580_v17 = vld [vmem:[#allocation5 + $0x1e4] ss:$12 sps:$4 sm:$0xff]   ;;  %v2582_v18 = vld [vmem:[#allocation5 + $0x60] ss:$12 sps:$4 sm:$0xff]   ;;  %v2584_v20 = vld [vmem:[#allocation5 + $0x7c] ss:$12 sps:$4 sm:$0xff]  }
  0x2e   :  { %1767 = vmatpush1.bf16.msra.mxu0 %v2565_v7  ;;  %1725 = vmatprep.subr.bf16.mxu1 %v2566_v8  ;;  %v2583_v19 = vld [vmem:[#allocation5 + $0x1e0] ss:$12 sps:$4 sm:$0xff]   ;;  %v2586_v21 = vld [vmem:[#allocation5 + $0x1fc] ss:$12 sps:$4 sm:$0xff]   ;;  %v2588_v22 = vld [vmem:[#allocation5 + $0x78] ss:$12 sps:$4 sm:$0xff]  }
  0x2f   :  { %1768 = vmatprep.subr.bf16.mxu0 %v2568_v9  ;;  %v2589_v23 = vld [vmem:[#allocation5 + $0x1f8] ss:$12 sps:$4 sm:$0xff]   ;;  %v2590_v24 = vld [vmem:[#allocation5 + $0x94] ss:$12 sps:$4 sm:$0xff]   ;;  %v2594_v26 = vld [vmem:[#allocation5 + $0x90] ss:$12 sps:$4 sm:$0xff]  }
  0x30   :  { %v2592_v25 = vld [vmem:[#allocation5 + $0x214] ss:$12 sps:$4 sm:$0xff]   ;;  %v2595_v27 = vld [vmem:[#allocation5 + $0x210] ss:$12 sps:$4 sm:$0xff]   ;;  %v2596_v28 = vld [vmem:[#allocation5 + $0xac] ss:$12 sps:$4 sm:$0xff]  }
  0x31   :  { %1726 = vmatpush1.bf16.msra.mxu1 %v2570_v10  ;;  %v2598_v29 = vld [vmem:[#allocation5 + $0x22c] ss:$12 sps:$4 sm:$0xff]   ;;  %v2600_v30 = vld [vmem:[#allocation5 + $0xa8] ss:$12 sps:$4 sm:$0xff]   ;;  %v2602_v32 = vld [vmem:[#allocation5 + $0xc4] ss:$12 sps:$4 sm:$0xff]  }
  0x32   :  { %1769 = vmatpush1.bf16.msra.mxu0 %v2571_v11  ;;  %1727 = vmatprep.subr.bf16.mxu1 %v2572_v12  ;;  %v2601_v31 = vld [vmem:[#allocation5 + $0x228] ss:$12 sps:$4 sm:$0xff]   ;;  %v2604_v33 = vld [vmem:[#allocation5 + $0x244] ss:$12 sps:$4 sm:$0xff]   ;;  %v2606_v34 = vld [vmem:[#allocation5 + $0xc0] ss:$12 sps:$4 sm:$0xff]  }
  0x33   :  { %1770 = vmatprep.subr.bf16.mxu0 %v2574_v13  ;;  %v2607_v35 = vld [vmem:[#allocation5 + $0x240] ss:$12 sps:$4 sm:$0xff]   ;;  %v2608_v36 = vld [vmem:[#allocation5 + $0xdc] ss:$12 sps:$4 sm:$0xff]   ;;  %v2612_v38 = vld [vmem:[#allocation5 + $0xd8] ss:$12 sps:$4 sm:$0xff]  }
  0x34   :  { %v2610_v37 = vld [vmem:[#allocation5 + $0x25c] ss:$12 sps:$4 sm:$0xff]   ;;  %v2613_v39 = vld [vmem:[#allocation5 + $0x258] ss:$12 sps:$4 sm:$0xff]   ;;  %v2614_v40 = vld [vmem:[#allocation5 + $0xf4] ss:$12 sps:$4 sm:$0xff]  }
  0x35   :  { %1728 = vmatpush1.bf16.msra.mxu1 %v2576_v14  ;;  %v2616_v41 = vld [vmem:[#allocation5 + $0x274] ss:$12 sps:$4 sm:$0xff]   ;;  %v2618_v42 = vld [vmem:[#allocation5 + $0xf0] ss:$12 sps:$4 sm:$0xff]   ;;  %v2620_v44 = vld [vmem:[#allocation5 + $0x10c] ss:$12 sps:$4 sm:$0xff]  }
  0x36   :  { %1771 = vmatpush1.bf16.msra.mxu0 %v2577_v15  ;;  %1729 = vmatprep.subr.bf16.mxu1 %v2578_v16  ;;  %v2619_v43 = vld [vmem:[#allocation5 + $0x270] ss:$12 sps:$4 sm:$0xff]   ;;  %v2622_v45 = vld [vmem:[#allocation5 + $0x28c] ss:$12 sps:$4 sm:$0xff]   ;;  %v2624_v46 = vld [vmem:[#allocation5 + $0x108] ss:$12 sps:$4 sm:$0xff]  }
  0x37   :  { %1772 = vmatprep.subr.bf16.mxu0 %v2580_v17  ;;  %v2625_v47 = vld [vmem:[#allocation5 + $0x288] ss:$12 sps:$4 sm:$0xff]   ;;  %v2626_v48 = vld [vmem:[#allocation5 + $0x124] ss:$12 sps:$4 sm:$0xff]   ;;  %v2630_v52 = vld [vmem:[#allocation5 + $0x120] ss:$12 sps:$4 sm:$0xff]  }
  0x38   :  { %v2652_v49 = vld [vmem:[#allocation2 + $0x4] ss:$40 sps:$4 sm:$0xff]   ;;  %v2628_v50 = vld [vmem:[#allocation5 + $0x2a4] ss:$12 sps:$4 sm:$0xff]   ;;  %v2631_v53 = vld [vmem:[#allocation5 + $0x2a0] ss:$12 sps:$4 sm:$0xff]  }
  0x39   :  { %1730 = vmatpush1.bf16.msra.mxu1 %v2582_v18  ;;  %v3014_v51 = vld [vmem:[#allocation2 + $0xc] ss:$40 sps:$4 sm:$0xff]   ;;  %1753 = vmatprep.mubr.bf16.mxu1 %v2652_v49  ;;  %v2638_v58 = vld [vmem:[#allocation5 + $0x154] ss:$12 sps:$4 sm:$0xff]   ;;  %v2644_v62 = vld [vmem:[#allocation5 + $0x16c] ss:$12 sps:$4 sm:$0xff]  }
  0x3a   :  { %1773 = vmatpush1.bf16.msra.mxu0 %v2583_v19  ;;  %1731 = vmatprep.subr.bf16.mxu1 %v2584_v20  ;;  %v2632_v54 = vld [vmem:[#allocation5 + $0x13c] ss:$12 sps:$4 sm:$0xff]   ;;  %v2636_v56 = vld [vmem:[#allocation5 + $0x138] ss:$12 sps:$4 sm:$0xff]   ;;  %v2640_v59 = vld [vmem:[#allocation5 + $0x2d4] ss:$12 sps:$4 sm:$0xff]  }
  0x3b   :  { %1774 = vmatprep.subr.bf16.mxu0 %v2586_v21  ;;  %1796 = vmatprep.mubr.bf16.mxu0 %v3014_v51  ;;  %v2634_v55 = vld [vmem:[#allocation5 + $0x2bc] ss:$12 sps:$4 sm:$0xff]   ;;  %v2637_v57 = vld [vmem:[#allocation5 + $0x2b8] ss:$12 sps:$4 sm:$0xff]   ;;  %v2656_v6 = vld [vmem:[#allocation5 + $0x300] ss:$12 sps:$4 sm:$0xff]  }
  0x3c   :  { %v2642_v60 = vld [vmem:[#allocation5 + $0x150] ss:$12 sps:$4 sm:$0xff]   ;;  %v2646_v63 = vld [vmem:[#allocation5 + $0x2ec] ss:$12 sps:$4 sm:$0xff]   ;;  %v2648_v0 = vld [vmem:[#allocation5 + $0x168] ss:$12 sps:$4 sm:$0xff]  }
  0x3d   :  { %1732 = vmatpush1.bf16.msra.mxu1 %v2588_v22  ;;  %v2643_v61 = vld [vmem:[#allocation5 + $0x2d0] ss:$12 sps:$4 sm:$0xff]   ;;  %v2649_v1 = vld [vmem:[#allocation5 + $0x2e8] ss:$12 sps:$4 sm:$0xff]   ;;  %v3019_v4 = vld [vmem:[#allocation2 + $0x8] ss:$40 sps:$4 sm:$0xff]  }
  0x3e   :  { %1775 = vmatpush1.bf16.msra.mxu0 %v2589_v23  ;;  %1733 = vmatprep.subr.bf16.mxu1 %v2590_v24  ;;  %v2658_v2 = vld [vmem:[#allocation5 + $0x304] ss:$12 sps:$4 sm:$0xff]   ;;  %v2659_v5 = vld [vmem:[#allocation5 + $0xc8] ss:$12 sps:$4 sm:$0xff]   ;;  %v2664_v9 = vld [vmem:[#allocation5 + $0xe0] ss:$12 sps:$4 sm:$0xff]  }
  0x3f   :  { %1776 = vmatprep.subr.bf16.mxu0 %v2592_v25  ;;  %v3017_v3 = vld [vmem:[#allocation2] ss:$40 sps:$4 sm:$0xff]   ;;  %v2660_v7 = vld [vmem:[#allocation5 + $0x8] ss:$12 sps:$4 sm:$0xff]   ;;  %v2665_v11 = vld [vmem:[#allocation5 + $0x20] ss:$12 sps:$4 sm:$0xff]  }
  0x40   :  { %v2663_v8 = vld [vmem:[#allocation5 + $0x31c] ss:$12 sps:$4 sm:$0xff]   ;;  %v2661_v10 = vld [vmem:[#allocation5 + $0x318] ss:$12 sps:$4 sm:$0xff]   ;;  %v2668_v12 = vld [vmem:[#allocation5 + $0x334] ss:$12 sps:$4 sm:$0xff]  }
  0x41   :  { %1734 = vmatpush1.bf16.msra.mxu1 %v2594_v26  ;;  %v2669_v13 = vld [vmem:[#allocation5 + $0xf8] ss:$12 sps:$4 sm:$0xff]   ;;  %v2666_v14 = vld [vmem:[#allocation5 + $0x330] ss:$12 sps:$4 sm:$0xff]   ;;  %v2671_v18 = vld [vmem:[#allocation5 + $0x348] ss:$12 sps:$4 sm:$0xff]  }
  0x42   :  { %1777 = vmatpush1.bf16.msra.mxu0 %v2595_v27  ;;  %1735 = vmatprep.subr.bf16.mxu1 %v2596_v28  ;;  %v2670_v15 = vld [vmem:[#allocation5 + $0x38] ss:$12 sps:$4 sm:$0xff]   ;;  %v2674_v17 = vld [vmem:[#allocation5 + $0x110] ss:$12 sps:$4 sm:$0xff]   ;;  %v2679_v21 = vld [vmem:[#allocation5 + $0x128] ss:$12 sps:$4 sm:$0xff]  }
  0x43   :  { %1778 = vmatprep.subr.bf16.mxu0 %v2598_v29  ;;  %v2673_v16 = vld [vmem:[#allocation5 + $0x34c] ss:$12 sps:$4 sm:$0xff]   ;;  %v2675_v19 = vld [vmem:[#allocation5 + $0x50] ss:$12 sps:$4 sm:$0xff]   ;;  %v2680_v23 = vld [vmem:[#allocation5 + $0x68] ss:$12 sps:$4 sm:$0xff]  }
  0x44   :  { %v2678_v20 = vld [vmem:[#allocation5 + $0x364] ss:$12 sps:$4 sm:$0xff]   ;;  %v2676_v22 = vld [vmem:[#allocation5 + $0x360] ss:$12 sps:$4 sm:$0xff]   ;;  %v2683_v24 = vld [vmem:[#allocation5 + $0x37c] ss:$12 sps:$4 sm:$0xff]  }
  0x45   :  { %1736 = vmatpush1.bf16.msra.mxu1 %v2600_v30  ;;  %v2684_v25 = vld [vmem:[#allocation5 + $0x140] ss:$12 sps:$4 sm:$0xff]   ;;  %v2681_v26 = vld [vmem:[#allocation5 + $0x378] ss:$12 sps:$4 sm:$0xff]   ;;  %v2686_v30 = vld [vmem:[#allocation5 + $0x390] ss:$12 sps:$4 sm:$0xff]  }
  0x46   :  { %1779 = vmatpush1.bf16.msra.mxu0 %v2601_v31  ;;  %1737 = vmatprep.subr.bf16.mxu1 %v2602_v32  ;;  %v2685_v27 = vld [vmem:[#allocation5 + $0x80] ss:$12 sps:$4 sm:$0xff]   ;;  %v2689_v29 = vld [vmem:[#allocation5 + $0x158] ss:$12 sps:$4 sm:$0xff]  }
  0x47   :  { %1780 = vmatprep.subr.bf16.mxu0 %v2604_v33  ;;  %v2688_v28 = vld [vmem:[#allocation5 + $0x394] ss:$12 sps:$4 sm:$0xff]   ;;  %v2690_v31 = vld [vmem:[#allocation5 + $0x98] ss:$12 sps:$4 sm:$0xff]   ;;  %v2694_v33 = vld [vmem:[#allocation5 + $0x170] ss:$12 sps:$4 sm:$0xff]  }
  0x48   :  { %v2693_v32 = vld [vmem:[#allocation5 + $0x3ac] ss:$12 sps:$4 sm:$0xff]  }
  0x49   :  { %1738 = vmatpush1.bf16.msra.mxu1 %v2606_v34  ;;  %v2691_v34 = vld [vmem:[#allocation5 + $0x3a8] ss:$12 sps:$4 sm:$0xff]  }
  0x4a   :  { %1781 = vmatpush1.bf16.msra.mxu0 %v2607_v35  ;;  %1739 = vmatprep.subr.bf16.mxu1 %v2608_v36  ;;  %v2695_v35 = vld [vmem:[#allocation5 + $0xb0] ss:$12 sps:$4 sm:$0xff]  }
  0x4b   :  { %1782 = vmatprep.subr.bf16.mxu0 %v2610_v37  ;;  %v2698_v36 = vld [vmem:[#allocation5 + $0x3c4] ss:$12 sps:$4 sm:$0xff]   ;;  %v2699_v37 = vld [vmem:[#allocation5 + $0x248] ss:$12 sps:$4 sm:$0xff]  }
  0x4d   :  { %1740 = vmatpush1.bf16.msra.mxu1 %v2612_v38  ;;  %v2696_v38 = vld [vmem:[#allocation5 + $0x3c0] ss:$12 sps:$4 sm:$0xff]  }
  0x4e   :  { %1783 = vmatpush1.bf16.msra.mxu0 %v2613_v39  ;;  %1741 = vmatprep.subr.bf16.mxu1 %v2614_v40  ;;  %v2700_v39 = vld [vmem:[#allocation5 + $0x188] ss:$12 sps:$4 sm:$0xff]  }
  0x4f   :  { %1784 = vmatprep.subr.bf16.mxu0 %v2616_v41  ;;  %v2703_v40 = vld [vmem:[#allocation5 + $0x3dc] ss:$12 sps:$4 sm:$0xff]   ;;  %v2704_v41 = vld [vmem:[#allocation5 + $0x260] ss:$12 sps:$4 sm:$0xff]  }
  0x51   :  { %1742 = vmatpush1.bf16.msra.mxu1 %v2618_v42  ;;  %v2701_v42 = vld [vmem:[#allocation5 + $0x3d8] ss:$12 sps:$4 sm:$0xff]  }
  0x52   :  { %1785 = vmatpush1.bf16.msra.mxu0 %v2619_v43  ;;  %1743 = vmatprep.subr.bf16.mxu1 %v2620_v44  ;;  %v2705_v43 = vld [vmem:[#allocation5 + $0x1a0] ss:$12 sps:$4 sm:$0xff]  }
  0x53   :  { %1786 = vmatprep.subr.bf16.mxu0 %v2622_v45  ;;  %v3024_v44 = vld [vmem:[#allocation2 + $0x14] ss:$40 sps:$4 sm:$0xff]   ;;  %v2708_v45 = vld [vmem:[#allocation5 + $0x3f4] ss:$12 sps:$4 sm:$0xff]  }
  0x55   :  { %1744 = vmatpush1.bf16.msra.mxu1 %v2624_v46  ;;  %v2709_v46 = vld [vmem:[#allocation5 + $0x278] ss:$12 sps:$4 sm:$0xff]  }
  0x56   :  { %1787 = vmatpush1.bf16.msra.mxu0 %v2625_v47  ;;  %1745 = vmatprep.subr.bf16.mxu1 %v2626_v48  ;;  %v2706_v47 = vld [vmem:[#allocation5 + $0x3f0] ss:$12 sps:$4 sm:$0xff]   ;;  %v2710_v48 = vld [vmem:[#allocation5 + $0x1b8] ss:$12 sps:$4 sm:$0xff]  }
  0x57   :  { %1788 = vmatprep.subr.bf16.mxu0 %v2628_v50  ;;  %v2714_v50 = vld [vmem:[#allocation5 + $0x290] ss:$12 sps:$4 sm:$0xff]  }
  0x59   :  { %1746 = vmatpush1.bf16.msra.mxu1 %v2630_v52  ;;  %v2711_v52 = vld [vmem:[#allocation5 + $0x408] ss:$12 sps:$4 sm:$0xff]  }
  0x5a   :  { %1789 = vmatpush1.bf16.msra.mxu0 %v2631_v53  ;;  %1747 = vmatprep.subr.bf16.mxu1 %v2632_v54  ;;  %v2715_v53 = vld [vmem:[#allocation5 + $0x1d0] ss:$12 sps:$4 sm:$0xff]  }
  0x5b   :  { %1790 = vmatprep.subr.bf16.mxu0 %v2634_v55  ;;  %v2718_v54 = vld [vmem:[#allocation5 + $0x424] ss:$12 sps:$4 sm:$0xff]   ;;  %v2719_v55 = vld [vmem:[#allocation5 + $0x2a8] ss:$12 sps:$4 sm:$0xff]  }
  0x5d   :  { %1748 = vmatpush1.bf16.msra.mxu1 %v2636_v56  ;;  %v2716_v56 = vld [vmem:[#allocation5 + $0x420] ss:$12 sps:$4 sm:$0xff]  }
  0x5e   :  { %1791 = vmatpush1.bf16.msra.mxu0 %v2637_v57  ;;  %1749 = vmatprep.subr.bf16.mxu1 %v2638_v58  ;;  %v2723_v57 = vld [vmem:[#allocation5 + $0x43c] ss:$12 sps:$4 sm:$0xff]   ;;  %v2724_v58 = vld [vmem:[#allocation5 + $0x2c0] ss:$12 sps:$4 sm:$0xff]  }
  0x5f   :  { %1792 = vmatprep.subr.bf16.mxu0 %v2640_v59  ;;  %v2721_v59 = vld [vmem:[#allocation5 + $0x438] ss:$12 sps:$4 sm:$0xff]  }
  0x61   :  { %1750 = vmatpush1.bf16.msra.mxu1 %v2642_v60  ;;  %v2725_v60 = vld [vmem:[#allocation5 + $0x200] ss:$12 sps:$4 sm:$0xff]  }
  0x62   :  { %1793 = vmatpush1.bf16.msra.mxu0 %v2643_v61  ;;  %1751 = vmatprep.subr.bf16.mxu1 %v2644_v62  ;;  %v2728_v61 = vld [vmem:[#allocation5 + $0x454] ss:$12 sps:$4 sm:$0xff]   ;;  %v2729_v62 = vld [vmem:[#allocation5 + $0x2d8] ss:$12 sps:$4 sm:$0xff]  }
  0x63   :  { %1794 = vmatprep.subr.bf16.mxu0 %v2646_v63  ;;  %v2726_v63 = vld [vmem:[#allocation5 + $0x450] ss:$12 sps:$4 sm:$0xff]  }
  0x65   :  { %1752 = vmatpush1.bf16.msra.mxu1 %v2648_v0  ;;  %v2730_v0 = vld [vmem:[#allocation5 + $0x218] ss:$12 sps:$4 sm:$0xff]  }
  0x66   :  { %1795 = vmatpush1.bf16.msra.mxu0 %v2649_v1  ;;  %2415 = vmatprep.subr.bf16.mxu1 %v2659_v5  ;;  %v2733_v1 = vld [vmem:[#allocation5 + $0x46c] ss:$12 sps:$4 sm:$0xff]   ;;  %v2735_v5 = vld [vmem:[#allocation5 + $0x230] ss:$12 sps:$4 sm:$0xff]  }
  0x67   :  { %1807 = vmatprep.subr.bf16.mxu0 %v2658_v2  ;;  %v2734_v2 = vld [vmem:[#allocation5 + $0x2f0] ss:$12 sps:$4 sm:$0xff]  }
  0x68   :  { %1754 = vmatmul.mubr.bf16.vlgmr.msra.gmra.mrb[0].mxu1 %v3017_v3 }
  0x69   :  { %1797 = vmatmul.mubr.bf16.vlgmr.msra.gmra.mrb[0].mxu0 %v3019_v4  ;;  %2416 = vmatpush3.bf16.msra.mxu1 %v2660_v7  ;;  %v2742_v7 = vld [vmem:[#allocation5 + $0x3c8] ss:$12 sps:$4 sm:$0xff]  }
  0x6a   :  { %1808 = vmatpush1.bf16.msra.mxu0 %v2656_v6  ;;  %2417 = vmatprep.subr.bf16.mxu1 %v2664_v9  ;;  %v2741_v6 = vld [vmem:[#allocation5 + $0x484] ss:$12 sps:$4 sm:$0xff]   ;;  %v2739_v9 = vld [vmem:[#allocation5 + $0x480] ss:$12 sps:$4 sm:$0xff]  }
  0x6b   :  { %1809 = vmatprep.subr.bf16.mxu0 %v2663_v8  ;;  %1968 = vmatprep.mubr.bf16.mxu1 %v2652_v49  ;;  %v2713_v49 = vld [vmem:[#allocation5 + $0x40c] ss:$12 sps:$4 sm:$0xff]   ;;  %v3028_v8 = vld [vmem:[#allocation2 + $0x10] ss:$40 sps:$4 sm:$0xff]  }
  0x6c   :  { %1839 = vmatprep.mubr.bf16.mxu0 %v3024_v44 }
  0x6d   :  { %2418 = vmatpush3.bf16.msra.mxu1 %v2665_v11  ;;  %v2746_v11 = vld [vmem:[#allocation5 + $0x49c] ss:$12 sps:$4 sm:$0xff]  }
  0x6e   :  { %1810 = vmatpush1.bf16.msra.mxu0 %v2661_v10  ;;  %2419 = vmatprep.subr.bf16.mxu1 %v2669_v13  ;;  %v2743_v10 = vld [vmem:[#allocation5 + $0x308] ss:$12 sps:$4 sm:$0xff]   ;;  %v2744_v13 = vld [vmem:[#allocation5 + $0x498] ss:$12 sps:$4 sm:$0xff]  }
  0x6f   :  { %1811 = vmatprep.subr.bf16.mxu0 %v2668_v12  ;;  %v2747_v12 = vld [vmem:[#allocation5 + $0x3e0] ss:$12 sps:$4 sm:$0xff]  }
  0x71   :  { %2420 = vmatpush3.bf16.msra.mxu1 %v2670_v15  ;;  %v2751_v15 = vld [vmem:[#allocation5 + $0x4b4] ss:$12 sps:$4 sm:$0xff]  }
  0x72   :  { %1812 = vmatpush1.bf16.msra.mxu0 %v2666_v14  ;;  %2421 = vmatprep.subr.bf16.mxu1 %v2674_v17  ;;  %v2748_v14 = vld [vmem:[#allocation5 + $0x320] ss:$12 sps:$4 sm:$0xff]   ;;  %v2749_v17 = vld [vmem:[#allocation5 + $0x4b0] ss:$12 sps:$4 sm:$0xff]  }
  0x73   :  { %1813 = vmatprep.subr.bf16.mxu0 %v2673_v16  ;;  %v2752_v16 = vld [vmem:[#allocation5 + $0x3f8] ss:$12 sps:$4 sm:$0xff]  }
  0x75   :  { %2422 = vmatpush3.bf16.msra.mxu1 %v2675_v19  ;;  %v2756_v19 = vld [vmem:[#allocation5 + $0x4cc] ss:$12 sps:$4 sm:$0xff]  }
  0x76   :  { %1814 = vmatpush1.bf16.msra.mxu0 %v2671_v18  ;;  %2423 = vmatprep.subr.bf16.mxu1 %v2679_v21  ;;  %v2753_v18 = vld [vmem:[#allocation5 + $0x338] ss:$12 sps:$4 sm:$0xff]   ;;  %v2758_v21 = vld [vmem:[#allocation5 + $0x350] ss:$12 sps:$4 sm:$0xff]  }
  0x77   :  { %1815 = vmatprep.subr.bf16.mxu0 %v2678_v20  ;;  %v2757_v20 = vld [vmem:[#allocation5 + $0x410] ss:$12 sps:$4 sm:$0xff]  }
  0x79   :  { %2424 = vmatpush3.bf16.msra.mxu1 %v2680_v23  ;;  %v2762_v23 = vld [vmem:[#allocation5 + $0x428] ss:$12 sps:$4 sm:$0xff]  }
  0x7a   :  { %1816 = vmatpush1.bf16.msra.mxu0 %v2676_v22  ;;  %2425 = vmatprep.subr.bf16.mxu1 %v2684_v25  ;;  %v2761_v22 = vld [vmem:[#allocation5 + $0x4e4] ss:$12 sps:$4 sm:$0xff]   ;;  %v2763_v25 = vld [vmem:[#allocation5 + $0x368] ss:$12 sps:$4 sm:$0xff]  }
  0x7b   :  { %1817 = vmatprep.subr.bf16.mxu0 %v2683_v24  ;;  %v2759_v24 = vld [vmem:[#allocation5 + $0x4e0] ss:$12 sps:$4 sm:$0xff]  }
  0x7d   :  { %2426 = vmatpush3.bf16.msra.mxu1 %v2685_v27  ;;  %v2767_v27 = vld [vmem:[#allocation5 + $0x440] ss:$12 sps:$4 sm:$0xff]  }
  0x7e   :  { %1818 = vmatpush1.bf16.msra.mxu0 %v2681_v26  ;;  %2427 = vmatprep.subr.bf16.mxu1 %v2689_v29  ;;  %v2766_v26 = vld [vmem:[#allocation5 + $0x4fc] ss:$12 sps:$4 sm:$0xff]   ;;  %v2768_v29 = vld [vmem:[#allocation5 + $0x380] ss:$12 sps:$4 sm:$0xff]  }
  0x7f   :  { %1819 = vmatprep.subr.bf16.mxu0 %v2688_v28  ;;  %v2764_v28 = vld [vmem:[#allocation5 + $0x4f8] ss:$12 sps:$4 sm:$0xff]  }
  0x81   :  { %2428 = vmatpush3.bf16.msra.mxu1 %v2690_v31  ;;  %v2772_v31 = vld [vmem:[#allocation5 + $0x458] ss:$12 sps:$4 sm:$0xff]  }
  0x82   :  { %1820 = vmatpush1.bf16.msra.mxu0 %v2686_v30  ;;  %2429 = vmatprep.subr.bf16.mxu1 %v2694_v33  ;;  %v2771_v30 = vld [vmem:[#allocation5 + $0x514] ss:$12 sps:$4 sm:$0xff]   ;;  %v2773_v33 = vld [vmem:[#allocation5 + $0x398] ss:$12 sps:$4 sm:$0xff]  }
  0x83   :  { %1821 = vmatprep.subr.bf16.mxu0 %v2693_v32  ;;  %v2769_v32 = vld [vmem:[#allocation5 + $0x510] ss:$12 sps:$4 sm:$0xff]  }
  0x85   :  { %2430 = vmatpush3.bf16.msra.mxu1 %v2695_v35  ;;  %v2777_v35 = vld [vmem:[#allocation5 + $0x470] ss:$12 sps:$4 sm:$0xff]  }
  0x86   :  { %1822 = vmatpush1.bf16.msra.mxu0 %v2691_v34  ;;  %2437 = vmatprep.subr.bf16.mxu1 %v2699_v37  ;;  %v2776_v34 = vld [vmem:[#allocation5 + $0x52c] ss:$12 sps:$4 sm:$0xff]   ;;  %v2774_v37 = vld [vmem:[#allocation5 + $0x528] ss:$12 sps:$4 sm:$0xff]  }
  0x87   :  { %1823 = vmatprep.subr.bf16.mxu0 %v2698_v36  ;;  %v2821_v36 = vld [vmem:[#allocation2 + $0x1c] ss:$40 sps:$4 sm:$0xff]  }
  0x88   :  { %1969 = vmatmul.mubr.bf16.vlgmr.msra.gmra.mrb[4].mxu1 %v3017_v3  ;;  %v2731_v3 = vld [vmem:[#allocation5 + $0x468] ss:$12 sps:$4 sm:$0xff]  }
  0x89   :  { %2438 = vmatpush3.bf16.msra.mxu1 %v2700_v39  ;;  %2009 = vmatprep.mubr.bf16.mxu1 %v3014_v51  ;;  %v2720_v51 = vld [vmem:[#allocation5 + $0x1e8] ss:$12 sps:$4 sm:$0xff]   ;;  %v2781_v39 = vld [vmem:[#allocation5 + $0x544] ss:$12 sps:$4 sm:$0xff]  }
  0x8a   :  { %1824 = vmatpush1.bf16.msra.mxu0 %v2696_v38  ;;  %2439 = vmatprep.subr.bf16.mxu1 %v2704_v41  ;;  %v2778_v38 = vld [vmem:[#allocation5 + $0x3b0] ss:$12 sps:$4 sm:$0xff]   ;;  %v2779_v41 = vld [vmem:[#allocation5 + $0x540] ss:$12 sps:$4 sm:$0xff]  }
  0x8b   :  { %1825 = vmatprep.subr.bf16.mxu0 %v2703_v40  ;;  %v2782_v40 = vld [vmem:[#allocation5 + $0x548] ss:$12 sps:$4 sm:$0xff]  }
  0x8d   :  { %2440 = vmatpush3.bf16.msra.mxu1 %v2705_v43  ;;  %v2786_v43 = vld [vmem:[#allocation5 + $0x55c] ss:$12 sps:$4 sm:$0xff]  }
  0x8e   :  { %1826 = vmatpush1.bf16.msra.mxu0 %v2701_v42  ;;  %2441 = vmatprep.subr.bf16.mxu1 %v2709_v46  ;;  %v2783_v42 = vld [vmem:[#allocation5 + $0x488] ss:$12 sps:$4 sm:$0xff]   ;;  %v2788_v46 = vld [vmem:[#allocation5 + $0x4a0] ss:$12 sps:$4 sm:$0xff]  }
  0x8f   :  { %1827 = vmatprep.subr.bf16.mxu0 %v2708_v45  ;;  %v2784_v45 = vld [vmem:[#allocation5 + $0x558] ss:$12 sps:$4 sm:$0xff]  }
  0x91   :  { %2442 = vmatpush3.bf16.msra.mxu1 %v2710_v48  ;;  %v2792_v48 = vld [vmem:[#allocation5 + $0x578] ss:$12 sps:$4 sm:$0xff]  }
  0x92   :  { %1828 = vmatpush1.bf16.msra.mxu0 %v2706_v47  ;;  %2443 = vmatprep.subr.bf16.mxu1 %v2714_v50  ;;  %v2791_v47 = vld [vmem:[#allocation5 + $0x574] ss:$12 sps:$4 sm:$0xff]   ;;  %v2793_v50 = vld [vmem:[#allocation5 + $0x4b8] ss:$12 sps:$4 sm:$0xff]  }
  0x93   :  { %1829 = vmatprep.subr.bf16.mxu0 %v2713_v49  ;;  %v2789_v49 = vld [vmem:[#allocation5 + $0x570] ss:$12 sps:$4 sm:$0xff]  }
  0x95   :  { %2444 = vmatpush3.bf16.msra.mxu1 %v2715_v53  ;;  %v2797_v53 = vld [vmem:[#allocation5 + $0x590] ss:$12 sps:$4 sm:$0xff]  }
  0x96   :  { %1830 = vmatpush1.bf16.msra.mxu0 %v2711_v52  ;;  %2445 = vmatprep.subr.bf16.mxu1 %v2719_v55  ;;  %v2796_v52 = vld [vmem:[#allocation5 + $0x58c] ss:$12 sps:$4 sm:$0xff]   ;;  %v2798_v55 = vld [vmem:[#allocation5 + $0x4d0] ss:$12 sps:$4 sm:$0xff]  }
  0x97   :  { %1831 = vmatprep.subr.bf16.mxu0 %v2718_v54  ;;  %v2794_v54 = vld [vmem:[#allocation5 + $0x588] ss:$12 sps:$4 sm:$0xff]  }
  0x99   :  { %2446 = vmatpush3.bf16.msra.mxu1 %v2720_v51  ;;  %v2802_v51 = vld [vmem:[#allocation5 + $0x5a8] ss:$12 sps:$4 sm:$0xff]  }
  0x9a   :  { %1832 = vmatpush1.bf16.msra.mxu0 %v2716_v56  ;;  %2447 = vmatprep.subr.bf16.mxu1 %v2724_v58  ;;  %v2801_v56 = vld [vmem:[#allocation5 + $0x5a4] ss:$12 sps:$4 sm:$0xff]   ;;  %v2803_v58 = vld [vmem:[#allocation5 + $0x4e8] ss:$12 sps:$4 sm:$0xff]  }
  0x9b   :  { %1833 = vmatprep.subr.bf16.mxu0 %v2723_v57  ;;  %v2799_v57 = vld [vmem:[#allocation5 + $0x5a0] ss:$12 sps:$4 sm:$0xff]  }
  0x9d   :  { %2448 = vmatpush3.bf16.msra.mxu1 %v2725_v60  ;;  %v2807_v60 = vld [vmem:[#allocation5 + $0x5c0] ss:$12 sps:$4 sm:$0xff]  }
  0x9e   :  { %1834 = vmatpush1.bf16.msra.mxu0 %v2721_v59  ;;  %2449 = vmatprep.subr.bf16.mxu1 %v2729_v62  ;;  %v2806_v59 = vld [vmem:[#allocation5 + $0x5bc] ss:$12 sps:$4 sm:$0xff]   ;;  %v2808_v62 = vld [vmem:[#allocation5 + $0x500] ss:$12 sps:$4 sm:$0xff]  }
  0x9f   :  { %1835 = vmatprep.subr.bf16.mxu0 %v2728_v61  ;;  %v2804_v61 = vld [vmem:[#allocation5 + $0x5b8] ss:$12 sps:$4 sm:$0xff]  }
  0xa1   :  { %2450 = vmatpush3.bf16.msra.mxu1 %v2730_v0  ;;  %v2812_v0 = vld [vmem:[#allocation5 + $0x5d8] ss:$12 sps:$4 sm:$0xff]  }
  0xa2   :  { %1836 = vmatpush1.bf16.msra.mxu0 %v2726_v63  ;;  %2451 = vmatprep.subr.bf16.mxu1 %v2734_v2  ;;  %v2811_v63 = vld [vmem:[#allocation5 + $0x5d4] ss:$12 sps:$4 sm:$0xff]   ;;  %v2813_v2 = vld [vmem:[#allocation5 + $0x518] ss:$12 sps:$4 sm:$0xff]  }
  0xa3   :  { %1837 = vmatprep.subr.bf16.mxu0 %v2733_v1  ;;  %v2809_v1 = vld [vmem:[#allocation5 + $0x5d0] ss:$12 sps:$4 sm:$0xff]  }
  0xa5   :  { %2452 = vmatpush3.bf16.msra.mxu1 %v2735_v5  ;;  %v2817_v5 = vld [vmem:[#allocation5 + $0x5f0] ss:$12 sps:$4 sm:$0xff]  }
  0xa6   :  { %1838 = vmatpush1.bf16.msra.mxu0 %v2731_v3  ;;  %2459 = vmatprep.subr.bf16.mxu1 %v2742_v7  ;;  %v2816_v3 = vld [vmem:[#allocation5 + $0x5ec] ss:$12 sps:$4 sm:$0xff]   ;;  %v2818_v7 = vld [vmem:[#allocation5 + $0x530] ss:$12 sps:$4 sm:$0xff]  }
  0xa7   :  { %1850 = vmatprep.subr.bf16.mxu0 %v2741_v6  ;;  %v2814_v6 = vld [vmem:[#allocation5 + $0x5e8] ss:$12 sps:$4 sm:$0xff]  }
  0xa8   :  { %2010 = vmatmul.mubr.bf16.vlgmr.msra.gmra.mrb[8].mxu1 %v3019_v4  ;;  %v2754_v4 = vld [vmem:[#allocation5 + $0x4c8] ss:$12 sps:$4 sm:$0xff]  }
  0xa9   :  { %1840 = vmatmul.mubr.bf16.vlgmr.msra.gmra.mrb[0].mxu0 %v3028_v8  ;;  %2460 = vmatpush3.bf16.msra.mxu1 %v2743_v10  ;;  %v2819_v10 = vld [vmem:[#allocation2 + $0x18] ss:$40 sps:$4 sm:$0xff]  }
  0xaa   :  { %1851 = vmatpush1.bf16.msra.mxu0 %v2739_v9  ;;  %2461 = vmatprep.subr.bf16.mxu1 %v2747_v12  ;;  %v2825_v9 = vld [vmem:[#allocation5 + $0x6c8] ss:$12 sps:$4 sm:$0xff]  }
  0xab   :  { %1852 = vmatprep.subr.bf16.mxu0 %v2746_v11  ;;  %2050 = vmatprep.mubr.bf16.mxu1 %v3024_v44  ;;  %v2787_v44 = vld [vmem:[#allocation5 + $0x560] ss:$12 sps:$4 sm:$0xff]   ;;  %v2826_v12 = vld [vmem:[#allocation5 + $0x608] ss:$12 sps:$4 sm:$0xff]  }
  0xac   :  { %1882 = vmatprep.mubr.bf16.mxu0 %v2821_v36  ;;  %v2822_v11 = vld [vmem:[#allocation5 + $0x600] ss:$12 sps:$4 sm:$0xff]  }
  0xad   :  { %2462 = vmatpush3.bf16.msra.mxu1 %v2748_v14  ;;  %v2830_v14 = vld [vmem:[#allocation5 + $0x6e0] ss:$12 sps:$4 sm:$0xff]  }
  0xae   :  { %1853 = vmatpush1.bf16.msra.mxu0 %v2744_v13  ;;  %2463 = vmatprep.subr.bf16.mxu1 %v2752_v16  ;;  %v2829_v13 = vld [vmem:[#allocation5 + $0x61c] ss:$12 sps:$4 sm:$0xff]   ;;  %v2827_v16 = vld [vmem:[#allocation5 + $0x618] ss:$12 sps:$4 sm:$0xff]  }
  0xaf   :  { %1854 = vmatprep.subr.bf16.mxu0 %v2751_v15  ;;  %v2864_v15 = vld [vmem:[#allocation2 + $0x24] ss:$40 sps:$4 sm:$0xff]  }
  0xb1   :  { %2464 = vmatpush3.bf16.msra.mxu1 %v2753_v18  ;;  %v2834_v18 = vld [vmem:[#allocation5 + $0x634] ss:$12 sps:$4 sm:$0xff]  }
  0xb2   :  { %1855 = vmatpush1.bf16.msra.mxu0 %v2749_v17  ;;  %2465 = vmatprep.subr.bf16.mxu1 %v2757_v20  ;;  %v2831_v17 = vld [vmem:[#allocation5 + $0x620] ss:$12 sps:$4 sm:$0xff]   ;;  %v2832_v20 = vld [vmem:[#allocation5 + $0x630] ss:$12 sps:$4 sm:$0xff]  }
  0xb3   :  { %1856 = vmatprep.subr.bf16.mxu0 %v2756_v19  ;;  %v2835_v19 = vld [vmem:[#allocation5 + $0x6f8] ss:$12 sps:$4 sm:$0xff]  }
  0xb5   :  { %2466 = vmatpush3.bf16.msra.mxu1 %v2758_v21  ;;  %v2839_v21 = vld [vmem:[#allocation5 + $0x64c] ss:$12 sps:$4 sm:$0xff]  }
  0xb6   :  { %1857 = vmatpush1.bf16.msra.mxu0 %v2754_v4  ;;  %2467 = vmatprep.subr.bf16.mxu1 %v2762_v23  ;;  %v2836_v4 = vld [vmem:[#allocation5 + $0x638] ss:$12 sps:$4 sm:$0xff]   ;;  %v2837_v23 = vld [vmem:[#allocation5 + $0x648] ss:$12 sps:$4 sm:$0xff]  }
  0xb7   :  { %1858 = vmatprep.subr.bf16.mxu0 %v2761_v22  ;;  %v2840_v22 = vld [vmem:[#allocation5 + $0x710] ss:$12 sps:$4 sm:$0xff]  }
  0xb9   :  { %2468 = vmatpush3.bf16.msra.mxu1 %v2763_v25  ;;  %v2844_v25 = vld [vmem:[#allocation5 + $0x664] ss:$12 sps:$4 sm:$0xff]  }
  0xba   :  { %1859 = vmatpush1.bf16.msra.mxu0 %v2759_v24  ;;  %2469 = vmatprep.subr.bf16.mxu1 %v2767_v27  ;;  %v2841_v24 = vld [vmem:[#allocation5 + $0x650] ss:$12 sps:$4 sm:$0xff]   ;;  %v2842_v27 = vld [vmem:[#allocation5 + $0x660] ss:$12 sps:$4 sm:$0xff]  }
  0xbb   :  { %1860 = vmatprep.subr.bf16.mxu0 %v2766_v26  ;;  %v2845_v26 = vld [vmem:[#allocation5 + $0x728] ss:$12 sps:$4 sm:$0xff]  }
  0xbd   :  { %2470 = vmatpush3.bf16.msra.mxu1 %v2768_v29  ;;  %v2849_v29 = vld [vmem:[#allocation5 + $0x67c] ss:$12 sps:$4 sm:$0xff]  }
  0xbe   :  { %1861 = vmatpush1.bf16.msra.mxu0 %v2764_v28  ;;  %2471 = vmatprep.subr.bf16.mxu1 %v2772_v31  ;;  %v2846_v28 = vld [vmem:[#allocation5 + $0x668] ss:$12 sps:$4 sm:$0xff]   ;;  %v2847_v31 = vld [vmem:[#allocation5 + $0x678] ss:$12 sps:$4 sm:$0xff]  }
  0xbf   :  { %1862 = vmatprep.subr.bf16.mxu0 %v2771_v30  ;;  %v2850_v30 = vld [vmem:[#allocation5 + $0x740] ss:$12 sps:$4 sm:$0xff]  }
  0xc1   :  { %2472 = vmatpush3.bf16.msra.mxu1 %v2773_v33  ;;  %v2854_v33 = vld [vmem:[#allocation5 + $0x694] ss:$12 sps:$4 sm:$0xff]  }
  0xc2   :  { %1863 = vmatpush1.bf16.msra.mxu0 %v2769_v32  ;;  %2473 = vmatprep.subr.bf16.mxu1 %v2777_v35  ;;  %v2851_v32 = vld [vmem:[#allocation5 + $0x680] ss:$12 sps:$4 sm:$0xff]   ;;  %v2852_v35 = vld [vmem:[#allocation5 + $0x690] ss:$12 sps:$4 sm:$0xff]  }
  0xc3   :  { %1864 = vmatprep.subr.bf16.mxu0 %v2776_v34  ;;  %v2855_v34 = vld [vmem:[#allocation5 + $0x758] ss:$12 sps:$4 sm:$0xff]  }
  0xc5   :  { %2474 = vmatpush3.bf16.msra.mxu1 %v2778_v38  ;;  %v2860_v38 = vld [vmem:[#allocation5 + $0x770] ss:$12 sps:$4 sm:$0xff]  }
  0xc6   :  { %1865 = vmatpush1.bf16.msra.mxu0 %v2774_v37  ;;  %2481 = vmatprep.subr.bf16.mxu1 %v2782_v40  ;;  %v2859_v37 = vld [vmem:[#allocation5 + $0x6ac] ss:$12 sps:$4 sm:$0xff]   ;;  %v2861_v40 = vld [vmem:[#allocation5 + $0x6b0] ss:$12 sps:$4 sm:$0xff]  }
  0xc7   :  { %1866 = vmatprep.subr.bf16.mxu0 %v2781_v39  ;;  %v2857_v39 = vld [vmem:[#allocation5 + $0x6a8] ss:$12 sps:$4 sm:$0xff]  }
  0xc8   :  { %2051 = vmatmul.mubr.bf16.vlgmr.msra.gmra.mrb[12].mxu1 %v3028_v8  ;;  %v2824_v8 = vld [vmem:[#allocation5 + $0x604] ss:$12 sps:$4 sm:$0xff]  }
  0xc9   :  { %2482 = vmatpush3.bf16.msra.mxu1 %v2783_v42  ;;  %2091 = vmatprep.mubr.bf16.mxu1 %v2821_v36  ;;  %v2856_v36 = vld [vmem:[#allocation5 + $0x698] ss:$12 sps:$4 sm:$0xff]  }
  0xca   :  { %1867 = vmatpush1.bf16.msra.mxu0 %v2779_v41  ;;  %2483 = vmatprep.subr.bf16.mxu1 %v2787_v44  ;;  %v2867_v41 = vld [vmem:[#allocation5 + $0x6c4] ss:$12 sps:$4 sm:$0xff]   ;;  %v2870_v44 = vld [vmem:[#allocation5 + $0x6dc] ss:$12 sps:$4 sm:$0xff]  }
  0xcb   :  { %1868 = vmatprep.subr.bf16.mxu0 %v2786_v43  ;;  %v2862_v42 = vld [vmem:[#allocation2 + $0x20] ss:$40 sps:$4 sm:$0xff]   ;;  %v2865_v43 = vld [vmem:[#allocation5 + $0x6c0] ss:$12 sps:$4 sm:$0xff]  }
  0xcd   :  { %2484 = vmatpush3.bf16.msra.mxu1 %v2788_v46  ;;  %v2873_v46 = vld [vmem:[#allocation5 + $0x6f4] ss:$12 sps:$4 sm:$0xff]  }
  0xce   :  { %1869 = vmatpush1.bf16.msra.mxu0 %v2784_v45  ;;  %2485 = vmatprep.subr.bf16.mxu1 %v2792_v48  ;;  %v2868_v45 = vld [vmem:[#allocation5 + $0x6d8] ss:$12 sps:$4 sm:$0xff]  }
  0xcf   :  { %1870 = vmatprep.subr.bf16.mxu0 %v2791_v47  ;;  %v2871_v47 = vld [vmem:[#allocation5 + $0x6f0] ss:$12 sps:$4 sm:$0xff]   ;;  %v2876_v48 = vld [vmem:[#allocation5 + $0x70c] ss:$12 sps:$4 sm:$0xff]  }
  0xd1   :  { %2486 = vmatpush3.bf16.msra.mxu1 %v2793_v50  ;;  %v2879_v50 = vld [vmem:[#allocation5 + $0x724] ss:$12 sps:$4 sm:$0xff]  }
  0xd2   :  { %1871 = vmatpush1.bf16.msra.mxu0 %v2789_v49  ;;  %2487 = vmatprep.subr.bf16.mxu1 %v2797_v53  ;;  %v2874_v49 = vld [vmem:[#allocation5 + $0x708] ss:$12 sps:$4 sm:$0xff]  }
  0xd3   :  { %1872 = vmatprep.subr.bf16.mxu0 %v2796_v52  ;;  %v2877_v52 = vld [vmem:[#allocation5 + $0x720] ss:$12 sps:$4 sm:$0xff]   ;;  %v2882_v53 = vld [vmem:[#allocation5 + $0x73c] ss:$12 sps:$4 sm:$0xff]  }
  0xd5   :  { %2488 = vmatpush3.bf16.msra.mxu1 %v2798_v55  ;;  %v2885_v55 = vld [vmem:[#allocation5 + $0x754] ss:$12 sps:$4 sm:$0xff]  }
  0xd6   :  { %1873 = vmatpush1.bf16.msra.mxu0 %v2794_v54  ;;  %2489 = vmatprep.subr.bf16.mxu1 %v2802_v51  ;;  %v2880_v54 = vld [vmem:[#allocation5 + $0x738] ss:$12 sps:$4 sm:$0xff]  }
  0xd7   :  { %1874 = vmatprep.subr.bf16.mxu0 %v2801_v56  ;;  %v2883_v56 = vld [vmem:[#allocation5 + $0x750] ss:$12 sps:$4 sm:$0xff]   ;;  %v2888_v51 = vld [vmem:[#allocation5 + $0x76c] ss:$12 sps:$4 sm:$0xff]  }
  0xd9   :  { %2490 = vmatpush3.bf16.msra.mxu1 %v2803_v58 }
  0xda   :  { %1875 = vmatpush1.bf16.msra.mxu0 %v2799_v57  ;;  %2491 = vmatprep.subr.bf16.mxu1 %v2807_v60  ;;  %v2886_v57 = vld [vmem:[#allocation5 + $0x768] ss:$12 sps:$4 sm:$0xff]  }
  0xdb   :  { %1876 = vmatprep.subr.bf16.mxu0 %v2806_v59 }
  0xdd   :  { %2492 = vmatpush3.bf16.msra.mxu1 %v2808_v62 }
  0xde   :  { %1877 = vmatpush1.bf16.msra.mxu0 %v2804_v61  ;;  %2493 = vmatprep.subr.bf16.mxu1 %v2812_v0 }
  0xdf   :  { %1878 = vmatprep.subr.bf16.mxu0 %v2811_v63 }
  0xe1   :  { %2494 = vmatpush3.bf16.msra.mxu1 %v2813_v2 }
  0xe2   :  { %1879 = vmatpush1.bf16.msra.mxu0 %v2809_v1  ;;  %2495 = vmatprep.subr.bf16.mxu1 %v2817_v5  ;;  %v376_v5 = vlaneseq }
  0xe3   :  { %1880 = vmatprep.subr.bf16.mxu0 %v2816_v3 }
  0xe5   :  { %2496 = vmatpush3.bf16.msra.mxu1 %v2818_v7 }
  0xe6   :  { %1881 = vmatpush1.bf16.msra.mxu0 %v2814_v6  ;;  %2503 = vmatprep.subr.bf16.mxu1 %v2825_v9  ;;  %v377_v6 = vshrl.u32 %v376_v5, 7 }
  0xe7   :  { %1893 = vmatprep.subr.bf16.mxu0 %v2824_v8  ;;  %v374_v8 = vld [vmem:[%s3051_s2] sm:$0x7]  ;;  %s2967_s2 = smov [#allocation7]  }
  0xe8   :  { %2092 = vmatmul.mubr.bf16.vlgmr.msra.gmra.mrb[16].mxu1 %v2819_v10  ;;  %v386_v7 = vsub.s32 2, %v377_v6  ;;  %s2152_s13 = sshll.u32 %s2967_s2, 4  ;;  %s2153_s13 = int_to_ptr.vmem [resolvable:$true] %s2152_s13 }
  0xe9   :  { %1883 = vmatmul.mubr.bf16.vlgmr.msra.gmra.mrb[0].mxu0 %v2819_v10  ;;  %2504 = vmatpush3.bf16.msra.mxu1 %v2826_v12  ;;  %s2933_s14 = scalar_lea.vmem %s2153_s13, 768  ;;  %p2938_p3 = scmp.lt.s32.totalorder %s2153_s13, %s2153_s13 }
  0xea   :  { %1894 = vmatpush1.bf16.msra.mxu0 %v2822_v11  ;;  %2505 = vmatprep.subr.bf16.mxu1 %v2830_v14  ;;  %v387_v9 = vrot.slane %v374_v8, %v386_v7  ;;  %p2934_p2 = scmp.ne.s32.totalorder %s2153_s13, %s2933_s14  ;;  %p2939_p4 = scmp.lt.s32.totalorder %s2933_s14, %s2933_s14 }
  0xeb   :  { %1895 = vmatprep.subr.bf16.mxu0 %v2829_v13  ;;  %2132 = vmatprep.mubr.bf16.mxu1 %v2864_v15 }
  0xec   :  { %1925 = vmatprep.mubr.bf16.mxu0 %v2864_v15  ;;  %p2940_p5 = por %p2939_p4, %p2938_p3 }
  0xed   :  { %2506 = vmatpush3.bf16.msra.mxu1 %v2831_v17 }
  0xee   :  { %1896 = vmatpush1.bf16.msra.mxu0 %v2827_v16  ;;  %2507 = vmatprep.subr.bf16.mxu1 %v2835_v19  ;;  %p2941_p6 = pnand %p2940_p5, %p2934_p2 }
  0xef   :  { %1897 = vmatprep.subr.bf16.mxu0 %v2834_v18 }
  0xf1   :  { %2508 = vmatpush3.bf16.msra.mxu1 %v2836_v4 }
  0xf2   :  { %1898 = vmatpush1.bf16.msra.mxu0 %v2832_v20  ;;  %2509 = vmatprep.subr.bf16.mxu1 %v2840_v22 }
  0xf3   :  { %1899 = vmatprep.subr.bf16.mxu0 %v2839_v21 }
  0xf5   :  { %2510 = vmatpush3.bf16.msra.mxu1 %v2841_v24 }
  0xf6   :  { %1900 = vmatpush1.bf16.msra.mxu0 %v2837_v23  ;;  %2511 = vmatprep.subr.bf16.mxu1 %v2845_v26 }
  0xf7   :  { %1901 = vmatprep.subr.bf16.mxu0 %v2844_v25 }
  0xf9   :  { %2512 = vmatpush3.bf16.msra.mxu1 %v2846_v28 }
  0xfa   :  { %1902 = vmatpush1.bf16.msra.mxu0 %v2842_v27  ;;  %2513 = vmatprep.subr.bf16.mxu1 %v2850_v30 }
  0xfb   :  { %1903 = vmatprep.subr.bf16.mxu0 %v2849_v29 }
  0xfd   :  { %2514 = vmatpush3.bf16.msra.mxu1 %v2851_v32 }
  0xfe   :  { %1904 = vmatpush1.bf16.msra.mxu0 %v2847_v31  ;;  %2515 = vmatprep.subr.bf16.mxu1 %v2855_v34 }
  0xff   :  { %1905 = vmatprep.subr.bf16.mxu0 %v2854_v33 }
 0x101   :  { %2516 = vmatpush3.bf16.msra.mxu1 %v2856_v36 }
 0x102   :  { %1906 = vmatpush1.bf16.msra.mxu0 %v2852_v35  ;;  %2517 = vmatprep.subr.bf16.mxu1 %v2860_v38 }
 0x103   :  { %1907 = vmatprep.subr.bf16.mxu0 %v2859_v37 }
 0x105   :  { %2518 = vmatpush3.bf16.msra.mxu1 %v2861_v40 }
 0x106   :  { %1908 = vmatpush1.bf16.msra.mxu0 %v2857_v39 }
 0x107   :  { %1909 = vmatprep.subr.bf16.mxu0 %v2867_v41 }
 0x108   :  { %2133 = vmatmul.mubr.bf16.vlgmr.msra.gmra.mrb[20].mxu1 %v2862_v42 }
 0x10a   :  { %1910 = vmatpush1.bf16.msra.mxu0 %v2865_v43  ;;  %v378_v43 = vsub.s32 0, %v377_v6 }
 0x10b   :  { %1911 = vmatprep.subr.bf16.mxu0 %v2870_v44  ;;  %v382_v44 = vsub.s32 1, %v377_v6 }
 0x10e   :  { %1912 = vmatpush1.bf16.msra.mxu0 %v2868_v45  ;;  %v379_v45 = vrot.slane %v374_v8, %v378_v43 }
 0x10f   :  { %1913 = vmatprep.subr.bf16.mxu0 %v2873_v46  ;;  %v383_v46 = vrot.slane %v374_v8, %v382_v44 }
 0x112   :  { %1914 = vmatpush1.bf16.msra.mxu0 %v2871_v47 }
 0x113   :  { %1915 = vmatprep.subr.bf16.mxu0 %v2876_v48 }
 0x116   :  { %1916 = vmatpush1.bf16.msra.mxu0 %v2874_v49 }
 0x117   :  { %1917 = vmatprep.subr.bf16.mxu0 %v2879_v50 }
 0x11a   :  { %1918 = vmatpush1.bf16.msra.mxu0 %v2877_v52 }
 0x11b   :  { %1919 = vmatprep.subr.bf16.mxu0 %v2882_v53 }
 0x11e   :  { %1920 = vmatpush1.bf16.msra.mxu0 %v2880_v54 }
 0x11f   :  { %1921 = vmatprep.subr.bf16.mxu0 %v2885_v55 }
 0x122   :  { %1922 = vmatpush1.bf16.msra.mxu0 %v2883_v56 }
 0x123   :  { %1923 = vmatprep.subr.bf16.mxu0 %v2888_v51 }
 0x126   :  { %1924 = vmatpush1.bf16.msra.mxu0 %v2886_v57 }
 0x129   :  { %1926 = vmatmul.mubr.bf16.vlgmr.msra.gmra.mrb[0].mxu0 %v2862_v42 }
 0x13b   :  { %v1755_v58 = vpop.f32.mrb[0].mxu1 }
 0x13c   :  { %v1757_v59 = vpop.f32.mrb[1].mxu1  ;;  %v1756_v47 = vadd.f32 %v1755_v58, %v379_v45 }
 0x13d   :  { %v1759_v60 = vpop.f32.mrb[2].mxu1  ;;  %v1758_v48 = vadd.f32 %v1757_v59, %v383_v46 }
 0x13e   :  { %v1761_v61 = vpop.f32.mrb[3].mxu1  ;;  %v1760_v50 = vadd.f32 %v1759_v60, %v379_v45 }
 0x13f   :  { %v1762_v54 = vadd.f32 %v1761_v61, %v383_v46 }
 0x15b   :  { %v2431_v62 = vpop.f32.mrb[4].mxu1 }
 0x15c   :  { %v2432_v63 = vpop.f32.mrb[5].mxu1 }
 0x15d   :  { %v2433_v0 = vadd.f32 %v2432_v63, %v2431_v62  ;;  %v2434_v1 = vpop.f32.mrb[6].mxu1 }
 0x15e   :  { %v2435_v2 = vpop.f32.mrb[7].mxu1 }
 0x15f   :  { %v2436_v3 = vadd.f32 %v2435_v2, %v2434_v1  ;;  %v1971_v10 = vadd.f32 %v2433_v0, %v387_v9 }
 0x161   :  { %v1974_v16 = vadd.f32 %v2436_v3, %v387_v9 }
 0x17b   :  { %v2453_v11 = vpop.f32.mrb[8].mxu1 }
 0x17c   :  { %v2454_v12 = vpop.f32.mrb[9].mxu1 }
 0x17d   :  { %v2455_v13 = vadd.f32 %v2454_v12, %v2453_v11  ;;  %v2456_v14 = vpop.f32.mrb[10].mxu1 }
 0x17e   :  { %v2457_v15 = vpop.f32.mrb[11].mxu1 }
 0x17f   :  { %v2012_v17 = vadd.f32 %v2455_v13, %v1971_v10  ;;  %v2458_v18 = vadd.f32 %v2457_v15, %v2456_v14 }
 0x181   :  { %v2015_v19 = vadd.f32 %v2458_v18, %v1974_v16 }
 0x19b   :  { %v2475_v20 = vpop.f32.mrb[12].mxu1 }
 0x19c   :  { %v2476_v4 = vpop.f32.mrb[13].mxu1 }
 0x19d   :  { %v2477_v21 = vadd.f32 %v2476_v4, %v2475_v20  ;;  %v2478_v22 = vpop.f32.mrb[14].mxu1 }
 0x19e   :  { %v2479_v23 = vpop.f32.mrb[15].mxu1 }
 0x19f   :  { %v2053_v24 = vadd.f32 %v2477_v21, %v2012_v17  ;;  %v2480_v25 = vadd.f32 %v2479_v23, %v2478_v22 }
 0x1a1   :  { %v2056_v26 = vadd.f32 %v2480_v25, %v2015_v19 }
 0x1bb   :  { %v2497_v27 = vpop.f32.mrb[16].mxu1 }
 0x1bc   :  { %v2498_v28 = vpop.f32.mrb[17].mxu1 }
 0x1bd   :  { %v2499_v29 = vadd.f32 %v2498_v28, %v2497_v27  ;;  %v2500_v30 = vpop.f32.mrb[18].mxu1 }
 0x1be   :  { %v2501_v31 = vpop.f32.mrb[19].mxu1 }
 0x1bf   :  { %v2094_v32 = vadd.f32 %v2499_v29, %v2053_v24  ;;  %v2502_v33 = vadd.f32 %v2501_v31, %v2500_v30 }
 0x1c1   :  { %v2097_v34 = vadd.f32 %v2502_v33, %v2056_v26 }
 0x1db   :  { %v2519_v35 = vpop.f32.mrb[20].mxu1 }
 0x1dc   :  { %v2520_v36 = vpop.f32.mrb[21].mxu1 }
 0x1dd   :  { %v2521_v37 = vadd.f32 %v2520_v36, %v2519_v35  ;;  %v2522_v38 = vpop.f32.mrb[22].mxu1 }
 0x1de   :  { %v2523_v39 = vpop.f32.mrb[23].mxu1 }
 0x1df   :  { %v2135_v40 = vadd.f32 %v2521_v37, %v2094_v32  ;;  %v2524_v41 = vadd.f32 %v2523_v39, %v2522_v38 }
 0x1e1   :  { %2143 = vst [vmem:[#allocation7 + $0x10] sm:$0xff] %v2135_v40  ;;  %v2138_v42 = vadd.f32 %v2524_v41, %v2097_v34 }
 0x1e3   :  { %2146 = vst [vmem:[#allocation7 + $0x28] sm:$0xff] %v2138_v42 }
 0x1fc   :  { %v1927_v49 = vpop.f32.mrb[0].mxu0 }
 0x1fd   :  { %v2526_v52 = vadd.f32 %v1927_v49, %v1756_v47  ;;  %v1929_v53 = vpop.f32.mrb[1].mxu0 }
 0x1fe   :  { %v2528_v55 = vadd.f32 %v1929_v53, %v1758_v48  ;;  %v1931_v56 = vpop.f32.mrb[2].mxu0 }
 0x1ff   :  { %2141 = vst [vmem:[#allocation7] sm:$0xff] %v2526_v52  ;;  %v2530_v51 = vadd.f32 %v1931_v56, %v1760_v50  ;;  %v1933_v57 = vpop.f32.mrb[3].mxu0 }
 0x200   :  { %2142 = vst [vmem:[#allocation7 + $0x8] sm:$0xff] %v2528_v55  ;;  %v2532_v62 = vadd.f32 %v1933_v57, %v1762_v54 }
 0x201   :  { %2144 = vst [vmem:[#allocation7 + $0x18] sm:$0xff] %v2530_v51 }
 0x202   :  { %2145 = vst [vmem:[#allocation7 + $0x20] sm:$0xff] %v2532_v62 }
 0x203   :  { %2944 = shalt.err (!%p2941_p6)
}
 0x204   :  { %s2945_s17 = scalar_lea.hbm %s3052_s3, 768 }
 0x205   :  { %p2946_p7 = scmp.ne.s32.totalorder %s3052_s3, %s2945_s17  ;;  %p2949_p8 = scmp.lt.u32.totalorder %s2945_s17, %s3052_s3 }
 0x207   :  { %p2951_p9 = pnand %p2949_p8, %p2946_p7 }
 0x209   :  { %2954 = shalt.err (!%p2951_p9)
}
 0x20a   :  { %s2968_s22 = smov 384   ;;  %s2969_s23 = smov 24  }
 0x20b   :  { %2158 = dma.vmem_to_hbm [thread:$0]  %s2153_s13, 768, %s3052_s3, [#allocation4], %s2968_s22, %s2968_s22, %s2969_s23  }
 0x20c   :  { %2959 = dma.done.wait [#allocation4], 768  }
 0x20d   :  { %2960 = vsyncadd [#allocation4], 4294966528 }
 0x20e   :  { %2162 = vsyncpa [#allocation3], 1 }
 0x20f   :  { %2163 = vsyncpa [#allocation6], 1 }
 0x210   :  { %2164 = vsyncpa [#allocation4], 1 }

</bundles_post_ra>
